<compile_context>
chip_gen: v5e
topology: v5e:2x2
jax: 0.10.0
libtpu: 0.0.40
codegen_flags: <defaults>
</compile_context>

<pallas_src>
from functools import partial

import jax
import jax.numpy as jnp
from jax.experimental import pallas as pl
from jax.experimental.pallas import tpu as pltpu

LANE = 128  # lane-dense output width


def _round_up(n, m):
    return ((n + m - 1) // m) * m


def qsnet_kernel(x_ref, w1_ref, b1_ref, w2_ref, b2_ref, w3_ref, b3_ref, o_ref, *, out_dim):
    """Fused MLP forward on one batch tile.

    x_ref:  (TB, D_IN)  f32  (cast to bf16 here, right before the first MXU matmul)
    w*_ref: bf16 weights (in, out); w3 pre-padded to 128 output lanes
    b*_ref: f32 biases (1, out); b3 pre-padded to 128 output lanes
    o_ref:  (TB, 128)   f32 log-probabilities (lanes >= out_dim hold -inf, sliced off by wrapper)
    """
    x = x_ref[...].astype(jnp.bfloat16)

    # PathedLayer(Linear1): relu(x @ W1 + b1)   -- MXU bf16 x bf16 -> f32 accumulation
    h1 = jnp.dot(x, w1_ref[...], preferred_element_type=jnp.float32) + b1_ref[...]
    h1 = jnp.maximum(h1, 0.0)

    # PathedLayer(Linear2): relu(h1 @ W2 + b2)
    h2 = jnp.dot(h1.astype(jnp.bfloat16), w2_ref[...],
                 preferred_element_type=jnp.float32) + b2_ref[...]
    h2 = jnp.maximum(h2, 0.0)

    # PathedLayer(Linear3): relu(h2 @ W3 + b3); W3/b3 are zero-padded to 128 output lanes,
    # so padded columns are exactly relu(0 + 0) = 0 here.
    h3 = jnp.dot(h2.astype(jnp.bfloat16), w3_ref[...],
                 preferred_element_type=jnp.float32) + b3_ref[...]
    h3 = jnp.maximum(h3, 0.0)

    # Mask the 128-out_dim padding lanes to -inf AFTER the ReLU so they cannot perturb the
    # max or the logsumexp normalizer.  (1, 128) iota broadcasts over the batch tile.
    col = jax.lax.broadcasted_iota(jnp.int32, (1, LANE), 1)
    logits = jnp.where(col < out_dim, h3, -jnp.inf)

    # LogSoftmax(dim=1), numerically stable, f32 math.
    m = jnp.max(logits, axis=-1, keepdims=True)
    s = logits - m
    lse = jnp.log(jnp.sum(jnp.exp(s), axis=-1, keepdims=True))
    o_ref[...] = s - lse


def qsnetwork_forward(x_nchw, params, *, tb_max=2048):
    """Flatten NCHW exactly like nn.Flatten, then run the batch-tiled fused kernel."""
    w1, b1, w2, b2, w3, b3 = params
    B = x_nchw.shape[0]
    d_in = w1.shape[0]
    h1_dim = w1.shape[1]
    h2_dim = w2.shape[1]
    out_dim = w3.shape[1]

    # Flatten (row-major over C,H,W == torch.nn.Flatten).  Metadata-only reshape; the f32 data
    # is streamed directly into the kernel (no wrapper-side bf16 cast pass over x).
    x = x_nchw.reshape(B, -1)

    # Batch tile: multiple of 8 sublanes.  No jnp.pad copy: grid = cdiv(B, tb) and Pallas masks
    # the stores of out-of-bounds rows in the last (partial) tile.
    tb = min(tb_max, _round_up(B, 8))
    grid = (pl.cdiv(B, tb),)

    # Lane-dense output layer: pad W3/b3 to 128 output columns with zeros (tiny, one-time).
    w3p = jnp.zeros((w3.shape[0], LANE), w3.dtype).at[:, :out_dim].set(w3)
    b3p = jnp.zeros((1, LANE), b3.dtype).at[:, :out_dim].set(b3)

    w1b = w1.astype(jnp.bfloat16)
    w2b = w2.astype(jnp.bfloat16)
    w3b = w3p.astype(jnp.bfloat16)
    b1f = b1.astype(jnp.float32)
    b2f = b2.astype(jnp.float32)
    b3f = b3p.astype(jnp.float32)

    # Weights/biases: constant block index -> DMA'd once, VMEM-resident across all grid steps.
    def resident(a):
        return pl.BlockSpec(a.shape, lambda i: (0,) * a.ndim)

    # Right-size the VMEM limit: double-buffered x/out tiles + resident weights + margin.
    x_tile_bytes = tb * d_in * 4
    out_tile_bytes = tb * LANE * 4
    weight_bytes = sum(int(a.size) * a.dtype.itemsize
                       for a in (w1b, b1f, w2b, b2f, w3b, b3f))
    vmem_limit = 2 * (x_tile_bytes + out_tile_bytes) + weight_bytes + (4 << 20)
    vmem_limit = max(16 << 20, min(vmem_limit, 48 << 20))

    # Advisory cost estimate for XLA's scheduler (workload is HBM-bound on x).
    cost = pl.CostEstimate(
        flops=2 * B * (d_in * h1_dim + h1_dim * h2_dim + h2_dim * LANE),
        transcendentals=B * (LANE + 1),
        bytes_accessed=B * d_in * 4 + B * LANE * 4 + weight_bytes,
    )

    out = pl.pallas_call(
        partial(qsnet_kernel, out_dim=out_dim),
        out_shape=jax.ShapeDtypeStruct((B, LANE), jnp.float32),
        grid=grid,
        in_specs=[
            pl.BlockSpec((tb, d_in), lambda i: (i, 0)),   # x streamed per batch tile (f32)
            resident(w1b), resident(b1f),
            resident(w2b), resident(b2f),
            resident(w3b), resident(b3f),
        ],
        out_specs=pl.BlockSpec((tb, LANE), lambda i: (i, 0)),
        compiler_params=pltpu.CompilerParams(
            dimension_semantics=("parallel",),            # shard batch tiles across v7x's 2 TCs
            vmem_limit_bytes=int(vmem_limit),
        ),
        cost_estimate=cost,
    )(x, w1b, b1f, w2b, b2f, w3b, b3f)

    # Column slice only (512 B/row read -> 40 B/row write); no row padding to strip.
    return out[:, :out_dim]


def qsnetwork_reference(x_nchw, params):
    """Pure-JAX reference with the same numerics (bf16 operands, f32 accumulation/elementwise)."""
    w1, b1, w2, b2, w3, b3 = params
    x = x_nchw.reshape(x_nchw.shape[0], -1).astype(jnp.bfloat16)
    w1b, w2b, w3b = (w.astype(jnp.bfloat16) for w in (w1, w2, w3))
    h = jnp.maximum(jnp.dot(x, w1b, preferred_element_type=jnp.float32) + b1, 0.0)
    h = jnp.maximum(jnp.dot(h.astype(jnp.bfloat16), w2b,
                            preferred_element_type=jnp.float32) + b2, 0.0)
    h = jnp.maximum(jnp.dot(h.astype(jnp.bfloat16), w3b,
                            preferred_element_type=jnp.float32) + b3, 0.0)
    return jax.nn.log_softmax(h, axis=-1)


def init_params(key, d_in, h1, h2, d_out):
    """Deterministic synthetic 'pretrained' Linear weights, stored (in, out) for x @ W."""
    ks = jax.random.split(key, 6)
    scale = lambda fan_in: 1.0 / jnp.sqrt(fan_in)
    w1 = jax.random.uniform(ks[0], (d_in, h1), jnp.float32, -scale(d_in), scale(d_in))
    b1 = jax.random.uniform(ks[1], (1, h1), jnp.float32, -scale(d_in), scale(d_in))
    w2 = jax.random.uniform(ks[2], (h1, h2), jnp.float32, -scale(h1), scale(h1))
    b2 = jax.random.uniform(ks[3], (1, h2), jnp.float32, -scale(h1), scale(h1))
    w3 = jax.random.uniform(ks[4], (h2, d_out), jnp.float32, -scale(h2), scale(h2))
    b3 = jax.random.uniform(ks[5], (1, d_out), jnp.float32, -scale(h2), scale(h2))
    return (w1, b1, w2, b2, w3, b3)


if __name__ == "__main__":
    key = jax.random.PRNGKey(0)
    k_x, k_p = jax.random.split(key)

    B, C, H, W = 2, 4, 16, 16          # small NCHW input
    D_IN, H1, H2, D_OUT = C * H * W, 32, 32, 10

    x = jax.random.normal(k_x, (B, C, H, W), dtype=jnp.float32)
    params = init_params(k_p, D_IN, H1, H2, D_OUT)

    out = qsnetwork_forward(x, params)
    out = jax.block_until_ready(out)
    ref = qsnetwork_reference(x, params)
    assert out.shape == (B, D_OUT)
    assert jnp.allclose(out, ref, atol=2e-4, rtol=2e-4), "Pallas output mismatch vs reference"

    # Exercise the multi-step grid + partial-last-tile (masked store) path with a ragged batch.
    k_x2 = jax.random.fold_in(k_x, 1)
    x2 = jax.random.normal(k_x2, (300, C, H, W), dtype=jnp.float32)
    out2 = jax.block_until_ready(qsnetwork_forward(x2, params, tb_max=128))
    ref2 = qsnetwork_reference(x2, params)
    assert out2.shape == (300, D_OUT)
    assert jnp.allclose(out2, ref2, atol=2e-4, rtol=2e-4), "Pallas grid-path mismatch vs reference"

    print("KERNEL_OK")
</pallas_src>

<mosaic_0001>
module attributes {stable_mosaic.version = 11 : i64} {
  func.func @qsnet_kernel(%arg0: i32, %arg1: memref<8x1024xf32, #tpu.memory_space<vmem>>, %arg2: memref<1024x32xbf16, #tpu.memory_space<vmem>>, %arg3: memref<1x32xf32, #tpu.memory_space<vmem>>, %arg4: memref<32x32xbf16, #tpu.memory_space<vmem>>, %arg5: memref<1x32xf32, #tpu.memory_space<vmem>>, %arg6: memref<32x128xbf16, #tpu.memory_space<vmem>>, %arg7: memref<1x128xf32, #tpu.memory_space<vmem>>, %arg8: memref<8x128xf32, #tpu.memory_space<vmem>>) attributes {dimension_semantics = [#tpu.dimension_semantics<parallel>], iteration_bounds = array<i64: 1>, scalar_prefetch = 0 : i64, scratch_operands = 0 : i64, tpu.core_type = #tpu.core_type<tc>, window_params = [{transform_indices = @transform_0, window_bounds = array<i64: 8, 1024>}, {pipeline_mode = #tpu.pipeline_mode<synchronous>, transform_indices = @transform_1, window_bounds = array<i64: 1024, 32>}, {pipeline_mode = #tpu.pipeline_mode<synchronous>, transform_indices = @transform_2, window_bounds = array<i64: 1, 32>}, {pipeline_mode = #tpu.pipeline_mode<synchronous>, transform_indices = @transform_3, window_bounds = array<i64: 32, 32>}, {pipeline_mode = #tpu.pipeline_mode<synchronous>, transform_indices = @transform_4, window_bounds = array<i64: 1, 32>}, {pipeline_mode = #tpu.pipeline_mode<synchronous>, transform_indices = @transform_5, window_bounds = array<i64: 32, 128>}, {pipeline_mode = #tpu.pipeline_mode<synchronous>, transform_indices = @transform_6, window_bounds = array<i64: 1, 128>}, {transform_indices = @transform_7, window_bounds = array<i64: 8, 128>}]} {
    %c0 = arith.constant 0 : index
    %c0_0 = arith.constant 0 : index
    %0 = vector.load %arg1[%c0, %c0_0] : memref<8x1024xf32, #tpu.memory_space<vmem>>, vector<8x1024xf32>
    %1 = arith.truncf %0 : vector<8x1024xf32> to vector<8x1024xbf16>
    %c0_1 = arith.constant 0 : index
    %c0_2 = arith.constant 0 : index
    %2 = vector.load %arg2[%c0_1, %c0_2] : memref<1024x32xbf16, #tpu.memory_space<vmem>>, vector<1024x32xbf16>
    %cst = arith.constant dense<0.000000e+00> : vector<8x32xf32>
    %3 = tpu.matmul %1, %2, %cst {dimension_numbers = #tpu.dot_dimension_numbers<[1], [0], [0], [1], [0, 0, 1, 1], [], []>} : vector<8x1024xbf16>, vector<1024x32xbf16>, vector<8x32xf32> -> vector<8x32xf32>
    %c0_3 = arith.constant 0 : index
    %c0_4 = arith.constant 0 : index
    %4 = vector.load %arg3[%c0_3, %c0_4] : memref<1x32xf32, #tpu.memory_space<vmem>>, vector<1x32xf32>
    %5 = vector.broadcast %4 : vector<1x32xf32> to vector<8x32xf32>
    %6 = arith.addf %3, %5 : vector<8x32xf32>
    %cst_5 = arith.constant 0.000000e+00 : f32
    %7 = vector.broadcast %cst_5 : f32 to vector<8x32xf32>
    %8 = arith.maximumf %6, %7 : vector<8x32xf32>
    %9 = arith.truncf %8 : vector<8x32xf32> to vector<8x32xbf16>
    %c0_6 = arith.constant 0 : index
    %c0_7 = arith.constant 0 : index
    %10 = vector.load %arg4[%c0_6, %c0_7] : memref<32x32xbf16, #tpu.memory_space<vmem>>, vector<32x32xbf16>
    %cst_8 = arith.constant dense<0.000000e+00> : vector<8x32xf32>
    %11 = tpu.matmul %9, %10, %cst_8 {dimension_numbers = #tpu.dot_dimension_numbers<[1], [0], [0], [1], [0, 0, 1, 1], [], []>} : vector<8x32xbf16>, vector<32x32xbf16>, vector<8x32xf32> -> vector<8x32xf32>
    %c0_9 = arith.constant 0 : index
    %c0_10 = arith.constant 0 : index
    %12 = vector.load %arg5[%c0_9, %c0_10] : memref<1x32xf32, #tpu.memory_space<vmem>>, vector<1x32xf32>
    %13 = vector.broadcast %12 : vector<1x32xf32> to vector<8x32xf32>
    %14 = arith.addf %11, %13 : vector<8x32xf32>
    %cst_11 = arith.constant 0.000000e+00 : f32
    %15 = vector.broadcast %cst_11 : f32 to vector<8x32xf32>
    %16 = arith.maximumf %14, %15 : vector<8x32xf32>
    %17 = arith.truncf %16 : vector<8x32xf32> to vector<8x32xbf16>
    %c0_12 = arith.constant 0 : index
    %c0_13 = arith.constant 0 : index
    %18 = vector.load %arg6[%c0_12, %c0_13] : memref<32x128xbf16, #tpu.memory_space<vmem>>, vector<32x128xbf16>
    %cst_14 = arith.constant dense<0.000000e+00> : vector<8x128xf32>
    %19 = tpu.matmul %17, %18, %cst_14 {dimension_numbers = #tpu.dot_dimension_numbers<[1], [0], [0], [1], [0, 0, 1, 1], [], []>} : vector<8x32xbf16>, vector<32x128xbf16>, vector<8x128xf32> -> vector<8x128xf32>
    %c0_15 = arith.constant 0 : index
    %c0_16 = arith.constant 0 : index
    %20 = vector.load %arg7[%c0_15, %c0_16] : memref<1x128xf32, #tpu.memory_space<vmem>>, vector<1x128xf32>
    %21 = vector.broadcast %20 : vector<1x128xf32> to vector<8x128xf32>
    %22 = arith.addf %19, %21 : vector<8x128xf32>
    %cst_17 = arith.constant 0.000000e+00 : f32
    %23 = vector.broadcast %cst_17 : f32 to vector<8x128xf32>
    %24 = arith.maximumf %22, %23 : vector<8x128xf32>
    %25 = tpu.iota {dimensions = array<i32: 1>} : vector<1x128xi32>
    %c10_i32 = arith.constant 10 : i32
    %26 = vector.broadcast %c10_i32 : i32 to vector<1x128xi32>
    %27 = arith.cmpi slt, %25, %26 : vector<1x128xi32>
    %cst_18 = arith.constant 0xFF800000 : f32
    %28 = vector.shape_cast %27 : vector<1x128xi1> to vector<1x128xi1>
    %29 = vector.broadcast %28 : vector<1x128xi1> to vector<8x128xi1>
    %30 = vector.broadcast %cst_18 : f32 to vector<8x128xf32>
    %31 = arith.select %29, %24, %30 : vector<8x128xi1>, vector<8x128xf32>
    %cst_19 = arith.constant dense<0xFF800000> : vector<8xf32>
    %32 = vector.multi_reduction <maximumf>, %31, %cst_19 [1] : vector<8x128xf32> to vector<8xf32>
    %33 = vector.shape_cast %32 : vector<8xf32> to vector<8x1xf32>
    %34 = vector.broadcast %33 : vector<8x1xf32> to vector<8x128xf32>
    %35 = arith.subf %31, %34 : vector<8x128xf32>
    %36 = math.exp %35 : vector<8x128xf32>
    %cst_20 = arith.constant dense<0.000000e+00> : vector<8xf32>
    %37 = vector.multi_reduction <add>, %36, %cst_20 [1] : vector<8x128xf32> to vector<8xf32>
    %38 = vector.shape_cast %37 : vector<8xf32> to vector<8x1xf32>
    %39 = math.log %38 : vector<8x1xf32>
    %40 = vector.broadcast %39 : vector<8x1xf32> to vector<8x128xf32>
    %41 = arith.subf %35, %40 : vector<8x128xf32>
    %c0_21 = arith.constant 0 : index
    %c0_22 = arith.constant 0 : index
    %42 = vector.load %arg8[%c0_21, %c0_22] : memref<8x128xf32, #tpu.memory_space<vmem>>, vector<8x128xf32>
    tpu.vector_store %arg8[%c0_21, %c0_22], %41 {strides = array<i32>} : memref<8x128xf32, #tpu.memory_space<vmem>>, vector<8x128xf32>,
    return
  }
  func.func @transform_0(%arg0: i32) -> (i32, i32) {
    %c0_i32 = arith.constant 0 : i32
    %c0_i32_0 = arith.constant 0 : i32
    return %arg0, %c0_i32 : i32, i32
  }
  func.func @transform_1(%arg0: i32) -> (i32, i32) {
    %c0_i32 = arith.constant 0 : i32
    %c0_i32_0 = arith.constant 0 : i32
    %c0_i32_1 = arith.constant 0 : i32
    return %c0_i32, %c0_i32_0 : i32, i32
  }
  func.func @transform_2(%arg0: i32) -> (i32, i32) {
    %c0_i32 = arith.constant 0 : i32
    %c0_i32_0 = arith.constant 0 : i32
    %c0_i32_1 = arith.constant 0 : i32
    return %c0_i32, %c0_i32_0 : i32, i32
  }
  func.func @transform_3(%arg0: i32) -> (i32, i32) {
    %c0_i32 = arith.constant 0 : i32
    %c0_i32_0 = arith.constant 0 : i32
    %c0_i32_1 = arith.constant 0 : i32
    return %c0_i32, %c0_i32_0 : i32, i32
  }
  func.func @transform_4(%arg0: i32) -> (i32, i32) {
    %c0_i32 = arith.constant 0 : i32
    %c0_i32_0 = arith.constant 0 : i32
    %c0_i32_1 = arith.constant 0 : i32
    return %c0_i32, %c0_i32_0 : i32, i32
  }
  func.func @transform_5(%arg0: i32) -> (i32, i32) {
    %c0_i32 = arith.constant 0 : i32
    %c0_i32_0 = arith.constant 0 : i32
    %c0_i32_1 = arith.constant 0 : i32
    return %c0_i32, %c0_i32_0 : i32, i32
  }
  func.func @transform_6(%arg0: i32) -> (i32, i32) {
    %c0_i32 = arith.constant 0 : i32
    %c0_i32_0 = arith.constant 0 : i32
    %c0_i32_1 = arith.constant 0 : i32
    return %c0_i32, %c0_i32_0 : i32, i32
  }
  func.func @transform_7(%arg0: i32) -> (i32, i32) {
    %c0_i32 = arith.constant 0 : i32
    %c0_i32_0 = arith.constant 0 : i32
    return %arg0, %c0_i32 : i32, i32
  }
}

</mosaic_0001>

<bundles_post_ra>
// kernel: tpu_custom_call.1
= control target key start
LH: loop header
LB: loop body
LE: loop exit
PB: predicated region body
PF: predicated region fallthrough
CT: control target
= control target key end

     0   :  { %12 = vsyncpa [#allocation3], 0  ;;  %vm725_vm0 = vcmask 261120   ;;  %s1477_s0 = inlined_call_operand.vmem [shape: f32[2,1024], index: 0, kind: input, shape index: {}]   ;;  %s1478_s1 = inlined_call_operand.vmem [shape: bf16[1024,32], index: 1, kind: input, shape index: {}]   ;;  %s1479_s2 = inlined_call_operand.vmem [shape: f32[1,32], index: 2, kind: input, shape index: {}]   ;;  %s1480_s3 = inlined_call_operand.vmem [shape: bf16[32,32], index: 3, kind: input, shape index: {}]   ;;  %s1481_s4 = inlined_call_operand.vmem [shape: f32[1,32], index: 4, kind: input, shape index: {}]   ;;  %s1482_s5 = inlined_call_operand.vmem [shape: bf16[32,128], index: 5, kind: input, shape index: {}]   ;;  %s1483_s6 = inlined_call_operand.vmem [shape: f32[1,128], index: 6, kind: input, shape index: {}]   ;;  %s1484_s7 = inlined_call_operand.hbm [shape: f32[2,128], index: 7, kind: output, shape index: {}]  }
   0x1   :  { %v1097_v0 = vld [vmem:[%s1478_s1 + $0x38] sm:$0xff]  ;;  %v1096_v4 = vld [vmem:[%s1478_s1 + $0x30] sm:$0xff]  ;;  %v1095_v8 = vld [vmem:[%s1478_s1 + $0x28] sm:$0xff] }
   0x2   :  { %v1105_v1 = vld [vmem:[%s1478_s1 + $0x78] sm:$0xff]  ;;  %599 = vmatpush.bf16.msra.mxu0 %v1097_v0  ;;  %v1104_v5 = vld [vmem:[%s1478_s1 + $0x70] sm:$0xff]  ;;  %v1103_v9 = vld [vmem:[%s1478_s1 + $0x68] sm:$0xff] }
   0x3   :  { %v1113_v2 = vld [vmem:[%s1478_s1 + $0xb8] sm:$0xff]  ;;  %612 = vmatpush.bf16.msra.mxu1 %v1105_v1  ;;  %v1112_v6 = vld [vmem:[%s1478_s1 + $0xb0] sm:$0xff]  ;;  %v1111_v10 = vld [vmem:[%s1478_s1 + $0xa8] sm:$0xff] }
   0x4   :  { %v1121_v3 = vld [vmem:[%s1478_s1 + $0xf8] sm:$0xff]  ;;  %625 = vmatpush.bf16.msra.mxu2 %v1113_v2  ;;  %v1120_v7 = vld [vmem:[%s1478_s1 + $0xf0] sm:$0xff]  ;;  %v1119_v11 = vld [vmem:[%s1478_s1 + $0xe8] sm:$0xff] }
   0x5   :  { %638 = vmatpush.bf16.msra.mxu3 %v1121_v3  ;;  %v1094_v12 = vld [vmem:[%s1478_s1 + $0x20] sm:$0xff]  ;;  %v1093_v16 = vld [vmem:[%s1478_s1 + $0x18] sm:$0xff]  ;;  %v30_v19 = vld [vmem:[%s1477_s0 + $0x10] sm:$0xff] }
   0x6   :  { %600 = vmatpush.bf16.msra.mxu0 %v1096_v4  ;;  %v1102_v13 = vld [vmem:[%s1478_s1 + $0x60] sm:$0xff]  ;;  %v1101_v17 = vld [vmem:[%s1478_s1 + $0x58] sm:$0xff]  ;;  %v34_v21 = vld [vmem:[%s1477_s0 + $0x30] sm:$0xff]  ;;  %46 = vst [vmem:[#allocation1 + $0x1] ss:$4 sm:$0xff] %v30_v19 }
   0x7   :  { %613 = vmatpush.bf16.msra.mxu1 %v1104_v5  ;;  %v1110_v14 = vld [vmem:[%s1478_s1 + $0xa0] sm:$0xff]  ;;  %v1109_v22 = vld [vmem:[%s1478_s1 + $0x98] sm:$0xff]  ;;  %50 = vst [vmem:[#allocation1 + $0x3] ss:$4 sm:$0xff] %v34_v21  ;;  %v1092_v24 = vld [vmem:[%s1478_s1 + $0x10] sm:$0xff] }
   0x8   :  { %626 = vmatpush.bf16.msra.mxu2 %v1112_v6  ;;  %v1118_v15 = vld [vmem:[%s1478_s1 + $0xe0] sm:$0xff]  ;;  %v1117_v23 = vld [vmem:[%s1478_s1 + $0xd8] sm:$0xff]  ;;  %v1100_v25 = vld [vmem:[%s1478_s1 + $0x50] sm:$0xff] }
   0x9   :  { %639 = vmatpush.bf16.msra.mxu3 %v1120_v7  ;;  %v28_v18 = vld [vmem:[%s1477_s0] sm:$0xff]  ;;  %v1108_v26 = vld [vmem:[%s1478_s1 + $0x90] sm:$0xff]  ;;  %v29_v28 = vld [vmem:[%s1477_s0 + $0x8] sm:$0xff] }
   0xa   :  { %601 = vmatpush.bf16.msra.mxu0 %v1095_v8  ;;  %v32_v20 = vld [vmem:[%s1477_s0 + $0x20] sm:$0xff]  ;;  %44 = vst [vmem:[#allocation1] ss:$4 sm:$0xff] %v28_v18  ;;  %v1116_v27 = vld [vmem:[%s1478_s1 + $0xd0] sm:$0xff]  ;;  %v31_v29 = vld [vmem:[%s1477_s0 + $0x18] sm:$0xff] }
   0xb   :  { %614 = vmatpush.bf16.msra.mxu1 %v1103_v9  ;;  %48 = vst [vmem:[#allocation1 + $0x2] ss:$4 sm:$0xff] %v32_v20  ;;  %v1091_v30 = vld [vmem:[%s1478_s1 + $0x8] sm:$0xff]  ;;  %v1090_v35 = vld [vmem:[%s1478_s1] sm:$0xff]  ;;  %v35_v36 = vld [vmem:[%s1477_s0 + $0x38] sm:$0xff] }
   0xc   :  { %627 = vmatpush.bf16.msra.mxu2 %v1111_v10  ;;  %v1099_v31 = vld [vmem:[%s1478_s1 + $0x48] sm:$0xff]  ;;  %52 = vst [vmem:[#allocation1 + $0x20] ss:$4 sm:$0xff] %v29_v28  ;;  %v1098_v37 = vld [vmem:[%s1478_s1 + $0x40] sm:$0xff]  ;;  %v1129_v40 = vld [vmem:[%s1478_s1 + $0x138] sm:$0xff] }
   0xd   :  { %640 = vmatpush.bf16.msra.mxu3 %v1119_v11  ;;  %v1107_v32 = vld [vmem:[%s1478_s1 + $0x88] sm:$0xff]  ;;  %54 = vst [vmem:[#allocation1 + $0x21] ss:$4 sm:$0xff] %v31_v29  ;;  %v1106_v38 = vld [vmem:[%s1478_s1 + $0x80] sm:$0xff]  ;;  %v1137_v42 = vld [vmem:[%s1478_s1 + $0x178] sm:$0xff] }
   0xe   :  { %602 = vmatpush.bf16.msra.mxu0 %v1094_v12  ;;  %v1115_v33 = vld [vmem:[%s1478_s1 + $0xc8] sm:$0xff]  ;;  %v1114_v39 = vld [vmem:[%s1478_s1 + $0xc0] sm:$0xff]  ;;  %58 = vst [vmem:[#allocation1 + $0x23] ss:$4 sm:$0xff] %v35_v36  ;;  %v1145_v46 = vld [vmem:[%s1478_s1 + $0x1b8] sm:$0xff] }
   0xf   :  { %615 = vmatpush.bf16.msra.mxu1 %v1102_v13  ;;  %v33_v34 = vld [vmem:[%s1477_s0 + $0x28] sm:$0xff]  ;;  %v1153_v47 = vld [vmem:[%s1478_s1 + $0x1f8] sm:$0xff]  ;;  %v1128_v52 = vld [vmem:[%s1478_s1 + $0x130] sm:$0xff] }
  0x10   :  { %628 = vmatpush.bf16.msra.mxu2 %v1110_v14  ;;  %56 = vst [vmem:[#allocation1 + $0x22] ss:$4 sm:$0xff] %v33_v34  ;;  %v1136_v53 = vld [vmem:[%s1478_s1 + $0x170] sm:$0xff]  ;;  %v1127_v56 = vld [vmem:[%s1478_s1 + $0x128] sm:$0xff]  ;;  %v1126_v60 = vld [vmem:[%s1478_s1 + $0x120] sm:$0xff] }
  0x11   :  { %641 = vmatpush.bf16.msra.mxu3 %v1118_v15  ;;  %v1144_v54 = vld [vmem:[%s1478_s1 + $0x1b0] sm:$0xff]  ;;  %v1135_v57 = vld [vmem:[%s1478_s1 + $0x168] sm:$0xff]  ;;  %v1134_v61 = vld [vmem:[%s1478_s1 + $0x160] sm:$0xff] }
  0x12   :  { %603 = vmatpush.bf16.msra.mxu0 %v1093_v16  ;;  %v61_v41 = vld.sshfl [vmem:[#allocation1 + $0x10] sm:$0xff pattern:$0x73625140]  ;;  %v59_v43 = vld.sshfl [vmem:[#allocation1] sm:$0xff pattern:$0x73625140] }
  0x13   :  { %616 = vmatpush.bf16.msra.mxu1 %v1101_v17  ;;  %v62_v44 = vld.sshfl [vmem:[#allocation1 + $0x18] sm:$0xff pattern:$0x73625140]  ;;  %v60_v45 = vld.sshfl [vmem:[#allocation1 + $0x8] sm:$0xff pattern:$0x73625140]  ;;  %v77_v48 = vpack.c.bf16 %v61_v41, %v61_v41  ;;  %v75_v49 = vpack.c.bf16 %v59_v43, %v59_v43 }
  0x14   :  { %629 = vmatpush.bf16.msra.mxu2 %v1109_v22  ;;  %v78_v50 = vpack.c.bf16 %v62_v44, %v62_v44  ;;  %v76_v51 = vpack.c.bf16 %v60_v45, %v60_v45  ;;  %v1152_v55 = vld [vmem:[%s1478_s1 + $0x1f0] sm:$0xff]  ;;  %v1143_v58 = vld [vmem:[%s1478_s1 + $0x1a8] sm:$0xff]  ;;  %v1142_v62 = vld [vmem:[%s1478_s1 + $0x1a0] sm:$0xff] }
  0x15   :  { %642 = vmatpush.bf16.msra.mxu3 %v1117_v23  ;;  %v1151_v59 = vld [vmem:[%s1478_s1 + $0x1e8] sm:$0xff]  ;;  %v1150_v63 = vld [vmem:[%s1478_s1 + $0x1e0] sm:$0xff]  ;;  %v1125_v0 = vld [vmem:[%s1478_s1 + $0x118] sm:$0xff] }
  0x16   :  { %604 = vmatpush.bf16.msra.mxu0 %v1092_v24  ;;  %v1133_v1 = vld [vmem:[%s1478_s1 + $0x158] sm:$0xff]  ;;  %v1124_v4 = vld [vmem:[%s1478_s1 + $0x110] sm:$0xff]  ;;  %v1123_v8 = vld [vmem:[%s1478_s1 + $0x108] sm:$0xff] }
  0x17   :  { %617 = vmatpush.bf16.msra.mxu1 %v1100_v25  ;;  %v1141_v2 = vld [vmem:[%s1478_s1 + $0x198] sm:$0xff]  ;;  %v1132_v5 = vld [vmem:[%s1478_s1 + $0x150] sm:$0xff]  ;;  %v1131_v9 = vld [vmem:[%s1478_s1 + $0x148] sm:$0xff] }
  0x18   :  { %630 = vmatpush.bf16.msra.mxu2 %v1108_v26  ;;  %v1149_v3 = vld [vmem:[%s1478_s1 + $0x1d8] sm:$0xff]  ;;  %v1140_v6 = vld [vmem:[%s1478_s1 + $0x190] sm:$0xff]  ;;  %v1139_v10 = vld [vmem:[%s1478_s1 + $0x188] sm:$0xff] }
  0x19   :  { %643 = vmatpush.bf16.msra.mxu3 %v1116_v27  ;;  %v1148_v7 = vld [vmem:[%s1478_s1 + $0x1d0] sm:$0xff]  ;;  %v1147_v11 = vld [vmem:[%s1478_s1 + $0x1c8] sm:$0xff]  ;;  %v1122_v12 = vld [vmem:[%s1478_s1 + $0x100] sm:$0xff] }
  0x1a   :  { %605 = vmatpush.bf16.msra.mxu0 %v1091_v30  ;;  %v1130_v13 = vld [vmem:[%s1478_s1 + $0x140] sm:$0xff]  ;;  %v64_v17 = vld.sshfl [vmem:[#allocation1 + $0x28] sm:$0xff pattern:$0x73625140] }
  0x1b   :  { %618 = vmatpush.bf16.msra.mxu1 %v1099_v31  ;;  %v1138_v14 = vld [vmem:[%s1478_s1 + $0x180] sm:$0xff]  ;;  %v65_v18 = vld.sshfl [vmem:[#allocation1 + $0x30] sm:$0xff pattern:$0x73625140]  ;;  %v80_v21 = vpack.c.bf16 %v64_v17, %v64_v17  ;;  %v1155_v24 = vld [vmem:[%s1480_s3 + $0x8] sm:$0xff] }
  0x1c   :  { %631 = vmatpush.bf16.msra.mxu2 %v1107_v32  ;;  %v1146_v15 = vld [vmem:[%s1478_s1 + $0x1c0] sm:$0xff]  ;;  %v66_v19 = vld.sshfl [vmem:[#allocation1 + $0x38] sm:$0xff pattern:$0x73625140]  ;;  %v81_v22 = vpack.c.bf16 %v65_v18, %v65_v18 }
  0x1d   :  { %644 = vmatpush.bf16.msra.mxu3 %v1115_v33  ;;  %v63_v16 = vld.sshfl [vmem:[#allocation1 + $0x20] sm:$0xff pattern:$0x73625140]  ;;  %v82_v23 = vpack.c.bf16 %v66_v19, %v66_v19  ;;  %v1157_v33 = vld [vmem:[%s1482_s5 + $0x8] sm:$0xff] }
  0x1e   :  { %606 = vmatpush.bf16.msra.mxu0 %v1090_v35  ;;  %v79_v20 = vpack.c.bf16 %v63_v16, %v63_v16  ;;  %v1154_v30 = vld [vmem:[%s1480_s3] sm:$0xff] }
  0x1f   :  { %619 = vmatpush.bf16.msra.mxu1 %v1098_v37  ;;  %v1161_v32 = vld [vmem:[%s1479_s2] ss:$0 sm:$0xff] }
  0x20   :  { %632 = vmatpush.bf16.msra.mxu2 %v1106_v38  ;;  %v1156_v36 = vld [vmem:[%s1482_s5] sm:$0xff] }
  0x21   :  { %645 = vmatpush.bf16.msra.mxu3 %v1114_v39  ;;  %607 = vmatmul.bf16.vlgmr.msra.gmra.mxu0 %v75_v49 }
  0x22   :  { %651 = vmatpush.bf16.msrb.mxu0 %v1129_v40  ;;  %620 = vmatmul.bf16.vlgmr.msra.gmra.mxu1 %v76_v51 }
  0x23   :  { %664 = vmatpush.bf16.msrb.mxu1 %v1137_v42  ;;  %633 = vmatmul.bf16.vlgmr.msra.gmra.mxu2 %v77_v48 }
  0x24   :  { %677 = vmatpush.bf16.msrb.mxu2 %v1145_v46  ;;  %646 = vmatmul.bf16.vlgmr.msra.gmra.mxu3 %v78_v50 }
  0x25   :  { %690 = vmatpush.bf16.msrb.mxu3 %v1153_v47 }
  0x26   :  { %652 = vmatpush.bf16.msrb.mxu0 %v1128_v52 }
  0x27   :  { %665 = vmatpush.bf16.msrb.mxu1 %v1136_v53 }
  0x28   :  { %678 = vmatpush.bf16.msrb.mxu2 %v1144_v54 }
  0x29   :  { %691 = vmatpush.bf16.msrb.mxu3 %v1152_v55  ;;  %v1162_v55 = vld [vmem:[%s1481_s4] ss:$0 sm:$0xff] }
  0x2a   :  { %653 = vmatpush.bf16.msrb.mxu0 %v1127_v56 }
  0x2b   :  { %666 = vmatpush.bf16.msrb.mxu1 %v1135_v57 }
  0x2c   :  { %679 = vmatpush.bf16.msrb.mxu2 %v1143_v58 }
  0x2d   :  { %692 = vmatpush.bf16.msrb.mxu3 %v1151_v59 }
  0x2e   :  { %654 = vmatpush.bf16.msrb.mxu0 %v1126_v60 }
  0x2f   :  { %667 = vmatpush.bf16.msrb.mxu1 %v1134_v61  ;;  %v781_v61 = vlaneseq }
  0x30   :  { %680 = vmatpush.bf16.msrb.mxu2 %v1142_v62  ;;  %v1163_v62 = vld [vmem:[%s1483_s6] ss:$0 sm:$0xff] }
  0x31   :  { %693 = vmatpush.bf16.msrb.mxu3 %v1150_v63  ;;  %v782_v63 = vand.u32 127, %v781_v61 }
  0x32   :  { %655 = vmatpush.bf16.msrb.mxu0 %v1125_v0 }
  0x33   :  { %668 = vmatpush.bf16.msrb.mxu1 %v1133_v1  ;;  %vm783_vm1 = vcmp.lt.s32.totalorder %v782_v63, 10 }
  0x34   :  { %681 = vmatpush.bf16.msrb.mxu2 %v1141_v2 }
  0x35   :  { %694 = vmatpush.bf16.msrb.mxu3 %v1149_v3 }
  0x36   :  { %656 = vmatpush.bf16.msrb.mxu0 %v1124_v4 }
  0x37   :  { %669 = vmatpush.bf16.msrb.mxu1 %v1132_v5 }
  0x38   :  { %682 = vmatpush.bf16.msrb.mxu2 %v1140_v6 }
  0x39   :  { %695 = vmatpush.bf16.msrb.mxu3 %v1148_v7 }
  0x3a   :  { %657 = vmatpush.bf16.msrb.mxu0 %v1123_v8 }
  0x3b   :  { %670 = vmatpush.bf16.msrb.mxu1 %v1131_v9 }
  0x3c   :  { %683 = vmatpush.bf16.msrb.mxu2 %v1139_v10 }
  0x3d   :  { %696 = vmatpush.bf16.msrb.mxu3 %v1147_v11 }
  0x3e   :  { %658 = vmatpush.bf16.msrb.mxu0 %v1122_v12 }
  0x3f   :  { %671 = vmatpush.bf16.msrb.mxu1 %v1130_v13 }
  0x40   :  { %684 = vmatpush.bf16.msrb.mxu2 %v1138_v14 }
  0x41   :  { %697 = vmatpush.bf16.msrb.mxu3 %v1146_v15  ;;  %659 = vmatmul.bf16.vlgmr.msrb.gmra.mxu0 %v79_v20 }
  0x42   :  { %672 = vmatmul.bf16.vlgmr.msrb.gmra.mxu1 %v80_v21  ;;  %735 = vmatpush.bf16.msra.mxu0 %v1155_v24 }
  0x43   :  { %685 = vmatmul.bf16.vlgmr.msrb.gmra.mxu2 %v81_v22  ;;  %773 = vmatpush.bf16.msra.mxu1 %v1157_v33 }
  0x44   :  { %698 = vmatmul.bf16.vlgmr.msrb.gmra.mxu3 %v82_v23 }
  0x46   :  { %736 = vmatpush.bf16.msra.mxu0 %v1154_v30 }
  0x47   :  { %774 = vmatpush.bf16.msra.mxu1 %v1156_v36 }
  0x9e   :  { %v608_v25 = vpop.f32.mrf.mxu0 }
  0x9f   :  { %v621_v26 = vpop.f32.mrf.mxu1  ;;  %v609_v37 = vadd.f32 %v1161_v32, %v608_v25 }
  0xa1   :  { %v622_v38 = vadd.f32 %v621_v26, %v609_v37 }
  0xa6   :  { %v634_v27 = vpop.f32.mrf.mxu2  ;;  %v610_v29 = vpop.f32.mrf.mxu0 }
  0xa7   :  { %v647_v28 = vpop.f32.mrf.mxu3  ;;  %v623_v31 = vpop.f32.mrf.mxu1  ;;  %v635_v39 = vadd.f32 %v634_v27, %v622_v38 }
  0xa9   :  { %v648_v40 = vadd.f32 %v647_v28, %v635_v39 }
  0xae   :  { %v636_v34 = vpop.f32.mrf.mxu2 }
  0xaf   :  { %v649_v35 = vpop.f32.mrf.mxu3 }
  0xbe   :  { %v660_v41 = vpop.f32.mrf.mxu0 }
  0xbf   :  { %v673_v42 = vpop.f32.mrf.mxu1  ;;  %v661_v43 = vadd.f32 %v660_v41, %v648_v40 }
  0xc1   :  { %v674_v44 = vadd.f32 %v673_v42, %v661_v43 }
  0xc6   :  { %v686_v45 = vpop.f32.mrf.mxu2  ;;  %v662_v48 = vpop.f32.mrf.mxu0 }
  0xc7   :  { %v699_v46 = vpop.f32.mrf.mxu3  ;;  %v687_v47 = vadd.f32 %v686_v45, %v674_v44  ;;  %v675_v49 = vpop.f32.mrf.mxu1 }
  0xc9   :  { %v700_v50 = vadd.f32 %v699_v46, %v687_v47 }
  0xcb   :  { %v703_v51 = vmax.f32 %v700_v50, 0.0 }
  0xcd   :  { %v704_v52 = vpack.c.bf16 %v703_v51, %v703_v51 }
  0xce   :  { %v688_v53 = vpop.f32.mrf.mxu2 }
  0xcf   :  { %v701_v54 = vpop.f32.mrf.mxu3  ;;  %1080 = vmatmul.msk.bf16.vlgmr.msra.gmra.mxu0 %vm725_vm0, %v704_v52 }
 0x14c   :  { %v738_v56 = vpop.f32.mrf.mxu0 }
 0x14d   :  { %v739_v57 = vadd.f32 %v1162_v55, %v738_v56 }
 0x14f   :  { %v742_v58 = vmax.f32 %v739_v57, 0.0 }
 0x151   :  { %v743_v59 = vpack.c.bf16 %v742_v58, %v742_v58 }
 0x153   :  { %1089 = vmatmul.msk.bf16.vlgmr.msra.gmra.mxu1 %vm725_vm0, %v743_v59 }
 0x154   :  { %v740_v60 = vpop.f32.mrf.mxu0 }
 0x1d0   :  { %v776_v0 = vpop.f32.mrf.mxu1 }
 0x1d1   :  { %v777_v1 = vadd.f32 %v1163_v62, %v776_v0 }
 0x1d3   :  { %v780_v2 = vmax.f32 %v777_v1, 0.0 }
 0x1d5   :  { %v786_v3 = vsel %vm783_vm1, %v780_v2, -inf }
 0x1d6   :  { %787 = vmax.xlane.f32.xlu0 %v786_v3 }
 0x1d8   :  { %v778_v4 = vpop.f32.mrf.mxu1 }
 0x249   :  { %v788_v5 = vpop.xlane.xlu0 %787 }
 0x24a   :  { %v789_v6 = vsub.f32 %v786_v3, %v788_v5 }
 0x24c   :  { %v790_v7 = vmul.f32 1.442695, %v789_v6 }
 0x24e   :  { %1164 = vpow2.f32 %v790_v7 }
 0x254   :  { %v1165_v8 = vpop.eup %1164 }
 0x255   :  { %792 = vadd.xlane.f32.xlu0 %v1165_v8 }
 0x2c8   :  { %v793_v9 = vpop.xlane.xlu0 %792 }
 0x2c9   :  { %1166 = vlog2.f32 %v793_v9 }
 0x2cf   :  { %v1167_v10 = vpop.eup %1166 }
 0x2d0   :  { %v795_v11 = vmul.f32 0.6931472, %v1167_v10 }
 0x2d2   :  { %v796_v12 = vsub.f32 %v789_v6, %v795_v11 }
 0x2d4   :  { %797 = vst [vmem:[#allocation2] sm:$0xff] %v796_v12 }
 0x2d5   :  { %801 = vsyncadd [#allocation3], 96  ;;  %s804_s0 = sshll.u32 %s1484_s7, 4  ;;  %s1194_s14 = smov [#allocation2]   ;;  %s805_s0 = int_to_ptr.hbm [resolvable:$true] %s804_s0 }
 0x2d6   :  { %s802_s15 = sshll.u32 %s1194_s14, 4  ;;  %s1195_s16 = smov 32   ;;  %s803_s15 = int_to_ptr.vmem [resolvable:$true] %s802_s15 }
 0x2d7   :  { %s1196_s17 = smov 2  }
 0x2d8   :  { %810 = dma.vmem_to_hbm [thread:$0]  %s803_s15, 32, %s805_s0, [#allocation3], %s1195_s16, %s1195_s16, %s1196_s17  }
 0x2d9   :  { %1192 = dma.done.wait [#allocation3], 128  }
 0x2da   :  { %1193 = vsyncadd [#allocation3], 4294967168 }
 0x2db   :  { %815 = vsyncpa [#allocation3], 1 }

</bundles_post_ra>
